<compile_context>
chip_gen: v6e
topology: v6e:2x2x1
jax: 0.10.0
libtpu: 0.0.40
codegen_flags: <defaults>
</compile_context>

<pallas_src>
import functools
import math

import numpy as np
import jax
import jax.numpy as jnp
from jax.experimental import pallas as pl
from jax.experimental.pallas import tpu as pltpu

# Below 64 MiB physical VMEM on v7x, above the default scoped limit on v5e/v6e.
VMEM_LIMIT = 48 * 1024 * 1024


def _round_up(x, m):
    return ((x + m - 1) // m) * m


# ----------------------------------------------------------------------------
# In-kernel helpers
# ----------------------------------------------------------------------------
def _rms_normalize(x, g, scale, eps):
    """lucidrains RMSNorm: x / max(||x|| * d^-0.5, eps) * g  (stats in f32)."""
    ss = jnp.sum(x * x, axis=-1, keepdims=True)
    norm = jnp.maximum(jnp.sqrt(ss) * scale, eps)
    return x * pl.reciprocal(norm, approx=True) * g


# ----------------------------------------------------------------------------
# Tiled linear (bias add fused):  out = x @ w + b
# ----------------------------------------------------------------------------
def _linear_kernel(x_ref, w_ref, b_ref, o_ref, acc_ref):
    k = pl.program_id(2)

    @pl.when(k == 0)
    def _():
        acc_ref[...] = jnp.zeros_like(acc_ref)

    acc_ref[...] += jnp.dot(
        x_ref[...].astype(jnp.bfloat16),
        w_ref[...].astype(jnp.bfloat16),
        preferred_element_type=jnp.float32,
    )

    @pl.when(k == pl.num_programs(2) - 1)
    def _():
        o_ref[...] = acc_ref[...] + b_ref[...]


def linear2d(x, w, b, tm=256, tn=512, tk=512):
    """x: [M, K], w: [K, N], b: [1, N] -> [M, N].  Tiled + pipelined."""
    M, K = x.shape
    N = w.shape[1]
    tm = min(_round_up(M, 8), tm)
    tn = min(_round_up(N, 128), tn)
    tk = min(_round_up(K, 128), tk)
    Mp, Kp, Np_ = _round_up(M, tm), _round_up(K, tk), _round_up(N, tn)
    xp = jnp.pad(x, ((0, Mp - M), (0, Kp - K))) if (Mp != M or Kp != K) else x
    wp = jnp.pad(w, ((0, Kp - K), (0, Np_ - N))) if (Kp != K or Np_ != N) else w
    bp = jnp.pad(b, ((0, 0), (0, Np_ - N))) if Np_ != N else b

    out = pl.pallas_call(
        _linear_kernel,
        grid=(Mp // tm, Np_ // tn, Kp // tk),
        in_specs=[
            pl.BlockSpec((tm, tk), lambda i, j, k: (i, k)),
            pl.BlockSpec((tk, tn), lambda i, j, k: (k, j)),
            pl.BlockSpec((1, tn), lambda i, j, k: (0, j)),
        ],
        out_specs=pl.BlockSpec((tm, tn), lambda i, j, k: (i, j)),
        out_shape=jax.ShapeDtypeStruct((Mp, Np_), jnp.float32),
        scratch_shapes=[pltpu.VMEM((tm, tn), jnp.float32)],
        compiler_params=pltpu.CompilerParams(
            dimension_semantics=("parallel", "parallel", "arbitrary"),
            vmem_limit_bytes=VMEM_LIMIT,
        ),
    )(xp, wp, bp)
    return out[:M, :N]


# ----------------------------------------------------------------------------
# Row-tiled RMSNorm (final encoder / decoder norm)
# ----------------------------------------------------------------------------
def _rmsnorm_kernel(x_ref, g_ref, o_ref, *, rms_scale, eps):
    o_ref[...] = _rms_normalize(x_ref[...], g_ref[...], rms_scale, eps)


def rmsnorm_rows(x2, g, eps=1e-8, tm=512):
    M, D = x2.shape
    tm = min(_round_up(M, 8), tm)
    Mp = _round_up(M, tm)
    if Mp != M:
        x2 = jnp.pad(x2, ((0, Mp - M), (0, 0)))
    kern = functools.partial(_rmsnorm_kernel, rms_scale=D ** -0.5, eps=eps)
    out = pl.pallas_call(
        kern,
        grid=(Mp // tm,),
        in_specs=[
            pl.BlockSpec((tm, D), lambda i: (i, 0)),
            pl.BlockSpec((1, D), lambda i: (0, 0)),
        ],
        out_specs=pl.BlockSpec((tm, D), lambda i: (i, 0)),
        out_shape=jax.ShapeDtypeStruct((Mp, D), jnp.float32),
        compiler_params=pltpu.CompilerParams(
            dimension_semantics=("parallel",), vmem_limit_bytes=VMEM_LIMIT
        ),
    )(x2, g)
    return out[:M]


# ----------------------------------------------------------------------------
# Fused attention sub-block: RMSNorm -> MHA (masked) -> LayerScale + residual
# ----------------------------------------------------------------------------
def _attn_block_kernel(
    xf_ref, xq_ref, bias_ref, g_ref,
    wq_ref, bq_ref, wk_ref, bk_ref, wv_ref, bv_ref, wp_ref, bp_ref, gamma_ref,
    o_ref, *, n_heads, sm_scale, rms_scale, eps,
):
    f32, bf16 = jnp.float32, jnp.bfloat16
    xf = xf_ref[0]      # (S, D)  keys/values source (full sequence)
    xq = xq_ref[0]      # (tq, D) query / residual tile
    g = g_ref[...]      # (1, D)
    S, D = xf.shape
    tq = xq.shape[0]

    nf = _rms_normalize(xf, g, rms_scale, eps)
    nq = _rms_normalize(xq, g, rms_scale, eps)
    nfh = jnp.broadcast_to(nf.astype(bf16)[None], (n_heads, S, D))
    nqh = jnp.broadcast_to(nq.astype(bf16)[None], (n_heads, tq, D))

    # Per-head projections as leading-batch einsums (no lane slices, no .T).
    q = jnp.einsum('hqd,hde->hqe', nqh, wq_ref[...].astype(bf16),
                   preferred_element_type=f32) + bq_ref[...]
    k = jnp.einsum('hkd,hde->hke', nfh, wk_ref[...].astype(bf16),
                   preferred_element_type=f32) + bk_ref[...]
    v = jnp.einsum('hkd,hde->hke', nfh, wv_ref[...].astype(bf16),
                   preferred_element_type=f32) + bv_ref[...]

    s = jnp.einsum('hqe,hke->hqk', q.astype(bf16), k.astype(bf16),
                   preferred_element_type=f32)
    s = s * sm_scale + bias_ref[...]                       # (1,1,S) key-mask bias
    s = s - jnp.max(s, axis=-1, keepdims=True)             # softmax stats in f32
    p = jnp.exp(s)
    p = p * pl.reciprocal(jnp.sum(p, axis=-1, keepdims=True), approx=True)

    ctx = jnp.einsum('hqk,hke->hqe', p.astype(bf16), v.astype(bf16),
                     preferred_element_type=f32)           # (H, tq, hd)
    outh = jnp.einsum('hqe,hed->hqd', ctx.astype(bf16), wp_ref[...].astype(bf16),
                      preferred_element_type=f32)          # (H, tq, D)
    out = jnp.sum(outh, axis=0) + bp_ref[...]              # (tq, D)

    o_ref[0] = xq + gamma_ref[...] * out                   # LayerScale + residual


def fused_attention_block(x, bias3, bp, n_heads, tq, eps=1e-8):
    """x: (B, S_pad, D) padded; bias3: (B, 1, S_pad) additive key mask."""
    B, S_pad, D = x.shape
    hd = D // n_heads
    nq = S_pad // tq
    kern = functools.partial(
        _attn_block_kernel, n_heads=n_heads, sm_scale=hd ** -0.5,
        rms_scale=D ** -0.5, eps=eps,
    )
    return pl.pallas_call(
        kern,
        grid=(B, nq),
        in_specs=[
            pl.BlockSpec((1, S_pad, D), lambda b, qi: (b, 0, 0)),   # keys/values
            pl.BlockSpec((1, tq, D), lambda b, qi: (b, qi, 0)),     # query tile
            pl.BlockSpec((1, 1, S_pad), lambda b, qi: (b, 0, 0)),   # key bias
            pl.BlockSpec((1, D), lambda b, qi: (0, 0)),             # norm1 gain
            pl.BlockSpec((n_heads, D, hd), lambda b, qi: (0, 0, 0)),
            pl.BlockSpec((n_heads, 1, hd), lambda b, qi: (0, 0, 0)),
            pl.BlockSpec((n_heads, D, hd), lambda b, qi: (0, 0, 0)),
            pl.BlockSpec((n_heads, 1, hd), lambda b, qi: (0, 0, 0)),
            pl.BlockSpec((n_heads, D, hd), lambda b, qi: (0, 0, 0)),
            pl.BlockSpec((n_heads, 1, hd), lambda b, qi: (0, 0, 0)),
            pl.BlockSpec((n_heads, hd, D), lambda b, qi: (0, 0, 0)),
            pl.BlockSpec((1, D), lambda b, qi: (0, 0)),             # proj bias
            pl.BlockSpec((1, D), lambda b, qi: (0, 0)),             # gamma1
        ],
        out_specs=pl.BlockSpec((1, tq, D), lambda b, qi: (b, qi, 0)),
        out_shape=jax.ShapeDtypeStruct((B, S_pad, D), jnp.float32),
        compiler_params=pltpu.CompilerParams(
            dimension_semantics=("parallel", "parallel"),
            vmem_limit_bytes=VMEM_LIMIT,
        ),
    )(x, x, bias3, bp["norm1_g"], bp["wq"], bp["bq"], bp["wk"], bp["bk"],
      bp["wv"], bp["bv"], bp["wp"], bp["bproj"], bp["gamma1"])


# ----------------------------------------------------------------------------
# Fused MLP sub-block: RMSNorm -> SwishGLU -> LayerScale + residual
# ----------------------------------------------------------------------------
def _mlp_block_kernel(
    x_ref, g_ref, wp_ref, bp_ref, wg_ref, bg_ref, w2_ref, b2_ref, gamma_ref,
    o_ref, *, rms_scale, eps,
):
    f32, bf16 = jnp.float32, jnp.bfloat16
    x = x_ref[...]
    n = _rms_normalize(x, g_ref[...], rms_scale, eps)
    nb = n.astype(bf16)
    proj = jnp.dot(nb, wp_ref[...].astype(bf16), preferred_element_type=f32) + bp_ref[...]
    gate = jnp.dot(nb, wg_ref[...].astype(bf16), preferred_element_type=f32) + bg_ref[...]
    act = proj * (gate * jax.nn.sigmoid(gate))             # SwishGLU
    out = jnp.dot(act.astype(bf16), w2_ref[...].astype(bf16),
                  preferred_element_type=f32) + b2_ref[...]
    o_ref[...] = x + gamma_ref[...] * out                  # LayerScale + residual


def fused_mlp_block(x, bp, eps=1e-8, tm=256):
    B, S, D = x.shape
    H = bp["w_proj"].shape[1]
    M = B * S
    x2 = x.reshape(M, D)
    tm = min(_round_up(M, 8), tm)
    Mp = _round_up(M, tm)
    if Mp != M:
        x2 = jnp.pad(x2, ((0, Mp - M), (0, 0)))
    kern = functools.partial(_mlp_block_kernel, rms_scale=D ** -0.5, eps=eps)
    out = pl.pallas_call(
        kern,
        grid=(Mp // tm,),
        in_specs=[
            pl.BlockSpec((tm, D), lambda i: (i, 0)),
            pl.BlockSpec((1, D), lambda i: (0, 0)),
            pl.BlockSpec((D, H), lambda i: (0, 0)),
            pl.BlockSpec((1, H), lambda i: (0, 0)),
            pl.BlockSpec((D, H), lambda i: (0, 0)),
            pl.BlockSpec((1, H), lambda i: (0, 0)),
            pl.BlockSpec((H, D), lambda i: (0, 0)),
            pl.BlockSpec((1, D), lambda i: (0, 0)),
            pl.BlockSpec((1, D), lambda i: (0, 0)),
        ],
        out_specs=pl.BlockSpec((tm, D), lambda i: (i, 0)),
        out_shape=jax.ShapeDtypeStruct((Mp, D), jnp.float32),
        compiler_params=pltpu.CompilerParams(
            dimension_semantics=("parallel",), vmem_limit_bytes=VMEM_LIMIT
        ),
    )(x2, bp["norm2_g"], bp["w_proj"], bp["b_proj"], bp["w_gate"], bp["b_gate"],
      bp["w2"], bp["b2"], bp["gamma2"])
    return out[:M].reshape(B, S, D)


# ----------------------------------------------------------------------------
# Masked norm-pixel MSE loss (row-tiled reduction with scratch accumulators)
# ----------------------------------------------------------------------------
def _loss_kernel(t_ref, r_ref, m_ref, o_ref, num_ref, den_ref, *, patch_dim):
    i = pl.program_id(0)

    @pl.when(i == 0)
    def _():
        num_ref[...] = jnp.zeros_like(num_ref)
        den_ref[...] = jnp.zeros_like(den_ref)

    t = t_ref[...]
    r = r_ref[...]
    m = m_ref[...]
    mu = jnp.mean(t, axis=-1, keepdims=True)
    var = jnp.sum((t - mu) ** 2, axis=-1, keepdims=True) * (1.0 / (patch_dim - 1))
    tn = (t - mu) * jax.lax.rsqrt(var + 1e-6)
    mse = jnp.mean((r - tn) ** 2, axis=-1, keepdims=True)   # (tm, 1)
    num_ref[...] += jnp.sum(mse * m, keepdims=True)
    den_ref[...] += jnp.sum(m, keepdims=True)

    @pl.when(i == pl.num_programs(0) - 1)
    def _():
        o_ref[...] = num_ref[...] / den_ref[...]


def masked_norm_pixel_loss(targets, recon, mask, tm=256):
    B, Np, P = targets.shape
    M = B * Np
    t2 = targets.reshape(M, P)
    r2 = recon.reshape(M, P)
    m2 = mask.reshape(M, 1)
    tm = min(_round_up(M, 8), tm)
    Mp = _round_up(M, tm)
    if Mp != M:
        t2 = jnp.pad(t2, ((0, Mp - M), (0, 0)))
        r2 = jnp.pad(r2, ((0, Mp - M), (0, 0)))
        m2 = jnp.pad(m2, ((0, Mp - M), (0, 0)))
    kern = functools.partial(_loss_kernel, patch_dim=P)
    out = pl.pallas_call(
        kern,
        grid=(Mp // tm,),
        in_specs=[
            pl.BlockSpec((tm, P), lambda i: (i, 0)),
            pl.BlockSpec((tm, P), lambda i: (i, 0)),
            pl.BlockSpec((tm, 1), lambda i: (i, 0)),
        ],
        out_specs=pl.BlockSpec((1, 1), lambda i: (0, 0)),
        out_shape=jax.ShapeDtypeStruct((1, 1), jnp.float32),
        scratch_shapes=[
            pltpu.VMEM((1, 1), jnp.float32),
            pltpu.VMEM((1, 1), jnp.float32),
        ],
        compiler_params=pltpu.CompilerParams(
            dimension_semantics=("arbitrary",), vmem_limit_bytes=VMEM_LIMIT
        ),
    )(t2, r2, m2)
    return out[0, 0]


# ----------------------------------------------------------------------------
# Plain-JAX / numpy glue
# ----------------------------------------------------------------------------
def patchify_cpp(img, p):
    """NCHW -> (B, Np, C*p*p), last dim ordered (c, ph, pw) to match Conv2d weights."""
    B, C, H, W = img.shape
    hp, wp = H // p, W // p
    x = img.reshape(B, C, hp, p, wp, p).transpose(0, 2, 4, 1, 3, 5)
    return x.reshape(B, hp * wp, C * p * p)


def patchify_loss(img, p):
    """NCHW -> (B, Np, p*p*C), last dim ordered (ph, pw, c) -- loss targets."""
    B, C, H, W = img.shape
    hp, wp = H // p, W // p
    x = img.reshape(B, C, hp, p, wp, p).transpose(0, 2, 4, 3, 5, 1)
    return x.reshape(B, hp * wp, p * p * C)


def _1d_sincos(embed_dim, pos):
    omega = np.arange(embed_dim // 2, dtype=np.float64) / (embed_dim / 2.0)
    omega = 1.0 / (10000 ** omega)
    out = np.einsum("m,d->md", pos.reshape(-1).astype(np.float64), omega)
    return np.concatenate([np.sin(out), np.cos(out)], axis=1)


def get_2d_varsize_sincos_pos_embed(embed_dim, grid_h, grid_w):
    gh = np.arange(grid_h, dtype=np.float32)
    gw = np.arange(grid_w, dtype=np.float32)
    grid = np.stack(np.meshgrid(gw, gh), axis=0).reshape(2, 1, grid_h, grid_w)
    emb_h = _1d_sincos(embed_dim // 2, grid[0])
    emb_w = _1d_sincos(embed_dim // 2, grid[1])
    return np.concatenate([emb_h, emb_w], axis=1).astype(np.float32)  # (H*W, D)


def xavier_uniform(key, fan_in, fan_out):
    limit = math.sqrt(6.0 / (fan_in + fan_out))
    return jax.random.uniform(key, (fan_in, fan_out), jnp.float32, -limit, limit)


def make_block_params(key, dim, n_heads, mlp_ratio):
    hidden = int(mlp_ratio * dim)
    hd = dim // n_heads
    ks = jax.random.split(key, 4)
    wqkv = xavier_uniform(ks[0], dim, 3 * dim)
    wq2, wk2, wv2 = wqkv[:, :dim], wqkv[:, dim:2 * dim], wqkv[:, 2 * dim:]
    wproj = xavier_uniform(ks[1], dim, dim)
    w1 = xavier_uniform(ks[2], dim, 2 * hidden)   # SwishGLU project -> 2*hidden
    w2 = xavier_uniform(ks[3], hidden, dim)

    def split_heads(w):  # (dim, dim) -> (H, dim, hd)  (per-head column groups)
        return jnp.transpose(w.reshape(dim, n_heads, hd), (1, 0, 2))

    zeros_hb = jnp.zeros((n_heads, 1, hd), jnp.float32)
    return dict(
        norm1_g=jnp.ones((1, dim), jnp.float32),
        wq=split_heads(wq2), bq=zeros_hb,
        wk=split_heads(wk2), bk=zeros_hb,
        wv=split_heads(wv2), bv=zeros_hb,
        wp=wproj.reshape(n_heads, hd, dim),          # per-head row groups
        bproj=jnp.zeros((1, dim), jnp.float32),
        gamma1=0.1 * jnp.ones((1, dim), jnp.float32),  # LayerScale
        norm2_g=jnp.ones((1, dim), jnp.float32),
        w_proj=w1[:, :hidden], b_proj=jnp.zeros((1, hidden), jnp.float32),
        w_gate=w1[:, hidden:], b_gate=jnp.zeros((1, hidden), jnp.float32),
        w2=w2, b2=jnp.zeros((1, dim), jnp.float32),
        gamma2=0.1 * jnp.ones((1, dim), jnp.float32),
    )


def init_vcond_params(key, cfg):
    ks = iter(jax.random.split(key, 64))
    De, Dd = cfg["enc_dim"], cfg["dec_dim"]
    p, C = cfg["patch_size"], cfg["in_channels"]
    hp, wp = cfg["img_size"][0] // p, cfg["img_size"][1] // p
    params = {}
    # TODO(synk): frozen pretrained DistilBERT has no Pallas equivalent; replaced
    # by a deterministic embedding-table "language model".
    params["lm_embed"] = 0.02 * jax.random.normal(
        next(ks), (cfg["vocab"], cfg["lang_dim"]), jnp.float32
    )
    params["lang2encoder_w"] = xavier_uniform(next(ks), cfg["lang_dim"], De)
    params["lang2encoder_b"] = jnp.zeros((1, De), jnp.float32)
    params["patch_w"] = xavier_uniform(next(ks), C * p * p, De)  # Conv2d as matmul
    params["patch_b"] = jnp.zeros((1, De), jnp.float32)
    params["encoder_pe"] = jnp.asarray(get_2d_varsize_sincos_pos_embed(De, hp, wp))[None]
    params["decoder_pe"] = jnp.asarray(get_2d_varsize_sincos_pos_embed(Dd, hp, wp))[None]
    params["img_token"] = 0.02 * jax.random.normal(next(ks), (1, 1, De), jnp.float32)
    params["lang_token"] = 0.02 * jax.random.normal(next(ks), (1, 1, De), jnp.float32)
    params["mask_token"] = 0.02 * jax.random.normal(next(ks), (1, 1, Dd), jnp.float32)
    params["encoder_blocks"] = [
        make_block_params(next(ks), De, cfg["enc_heads"], cfg["mlp_ratio"])
        for _ in range(cfg["enc_depth"])
    ]
    params["encoder_norm_g"] = jnp.ones((1, De), jnp.float32)
    params["enc2dec_w"] = xavier_uniform(next(ks), De, Dd)
    params["enc2dec_b"] = jnp.zeros((1, Dd), jnp.float32)
    params["decoder_blocks"] = [
        make_block_params(next(ks), Dd, cfg["dec_heads"], cfg["mlp_ratio"])
        for _ in range(cfg["dec_depth"])
    ]
    params["decoder_norm_g"] = jnp.ones((1, Dd), jnp.float32)
    params["pred_w"] = xavier_uniform(next(ks), Dd, p * p * C)
    params["pred_b"] = jnp.zeros((1, p * p * C), jnp.float32)
    return params


def transformer_stack(x, key_bias, blocks, n_heads, final_norm_g):
    """x: (B, S, D); key_bias: (B, S) additive key mask (0 or -1e30).

    Pads the sequence to a query-tile multiple once (padded tokens are excluded
    as attention keys via the bias), runs all fused blocks on the padded slab,
    applies the final RMSNorm, and slices back to S.
    """
    B, S, D = x.shape
    tq = min(_round_up(S, 8), 256)
    S_pad = _round_up(S, tq)
    if S_pad != S:
        x = jnp.pad(x, ((0, 0), (0, S_pad - S), (0, 0)))
        key_bias = jnp.pad(key_bias, ((0, 0), (0, S_pad - S)), constant_values=-1e30)
    bias3 = key_bias[:, None, :]  # (B, 1, S_pad)
    for bp in blocks:
        x = fused_attention_block(x, bias3, bp, n_heads, tq)
        x = fused_mlp_block(x, bp)
    x2 = rmsnorm_rows(x.reshape(B * S_pad, D), final_norm_g)
    return x2.reshape(B, S_pad, D)[:, :S, :]


def vcond_forward(params, cfg, img, input_ids, attention_mask, mask_rng, mask_ratio=None):
    """Reproduces VCond.forward: (loss, reconstructions, mask)."""
    B = img.shape[0]
    p = cfg["patch_size"]
    De, Dd = cfg["enc_dim"], cfg["dec_dim"]
    mask_ratio = cfg["mask_ratio"] if mask_ratio is None else mask_ratio

    # ---- frozen language model (synthetic) + lang2encoder ----
    lang_emb = params["lm_embed"][input_ids]  # (B, L, Dl)
    L, Dl = lang_emb.shape[1], lang_emb.shape[2]
    projected_lang = linear2d(
        lang_emb.reshape(B * L, Dl), params["lang2encoder_w"], params["lang2encoder_b"]
    ).reshape(B, L, De)

    # ---- patch embedding (Conv2d k=s=p lowered to matmul) + pos embed ----
    patches_flat = patchify_cpp(img, p)  # (B, Np, C*p*p)
    Np = patches_flat.shape[1]
    patches = linear2d(
        patches_flat.reshape(B * Np, -1), params["patch_w"], params["patch_b"]
    ).reshape(B, Np, De)
    patches_pe = patches + params["encoder_pe"]

    # ---- per-sample random masking (argsort/gather glue in plain JAX) ----
    n_keep = int(Np * (1 - mask_ratio))
    noise = jax.random.uniform(mask_rng, (B, Np))
    shuffle_idxs = jnp.argsort(noise, axis=1)
    restore_idxs = jnp.argsort(shuffle_idxs, axis=1)
    keep_idx = jnp.broadcast_to(shuffle_idxs[:, :n_keep, None], (B, n_keep, De))
    visible = jnp.take_along_axis(patches_pe, keep_idx, axis=1)
    mask = jnp.concatenate(
        [jnp.zeros((B, n_keep), jnp.float32), jnp.ones((B, Np - n_keep), jnp.float32)],
        axis=1,
    )
    mask = jnp.take_along_axis(mask, restore_idxs, axis=1)

    # ---- modality tokens, concat image+language ----
    visible = visible + params["img_token"]
    proj_lang = projected_lang + params["lang_token"]
    mm = jnp.concatenate([visible, proj_lang], axis=1)  # (B, S, De), S = n_keep + L
    mm_mask = jnp.concatenate(
        [jnp.ones((B, n_keep), attention_mask.dtype), attention_mask], axis=1
    )
    enc_bias = jnp.where(mm_mask == 0, -1e30, 0.0).astype(jnp.float32)  # (B, S)

    mm = transformer_stack(
        mm, enc_bias, params["encoder_blocks"], cfg["enc_heads"], params["encoder_norm_g"]
    )
    visible_patches = mm[:, :n_keep, :]  # == mm[:, :-L, :]

    # ---- decoder ----
    proj = linear2d(
        visible_patches.reshape(B * n_keep, De), params["enc2dec_w"], params["enc2dec_b"]
    ).reshape(B, n_keep, Dd)
    mask_tokens = jnp.broadcast_to(params["mask_token"], (B, Np - n_keep, Dd))
    concatenated = jnp.concatenate([proj, mask_tokens], axis=1)
    restore_full = jnp.broadcast_to(restore_idxs[:, :, None], (B, Np, Dd))
    unshuffled = jnp.take_along_axis(concatenated, restore_full, axis=1)
    dec = unshuffled + params["decoder_pe"]
    dec_bias = jnp.zeros((B, Np), jnp.float32)  # no key mask in decoder
    dec = transformer_stack(
        dec, dec_bias, params["decoder_blocks"], cfg["dec_heads"], params["decoder_norm_g"]
    )
    recon = linear2d(
        dec.reshape(B * Np, Dd), params["pred_w"], params["pred_b"]
    ).reshape(B, Np, -1)

    # ---- norm-pixel masked MSE loss (tiled Pallas reduction kernel) ----
    targets = patchify_loss(img, p)  # (B, Np, p*p*C)
    loss = masked_norm_pixel_loss(targets, recon, mask)
    return loss, recon, mask


# ----------------------------------------------------------------------------
if __name__ == "__main__":
    cfg = dict(
        img_size=(32, 32), patch_size=16, in_channels=3,
        enc_dim=32, enc_heads=2, enc_depth=2,
        dec_dim=16, dec_heads=2, dec_depth=1,
        lang_dim=16, vocab=50, mlp_ratio=4.0, mask_ratio=0.75,
    )
    key = jax.random.PRNGKey(0)
    k_param, k_img, k_ids, k_mask = jax.random.split(key, 4)
    params = init_vcond_params(k_param, cfg)

    B, L = 2, 8
    img = jax.random.normal(k_img, (B, cfg["in_channels"], *cfg["img_size"]), jnp.float32)
    input_ids = jax.random.randint(k_ids, (B, L), 0, cfg["vocab"])
    attention_mask = jnp.array([[1] * 6 + [0] * 2, [1] * 4 + [0] * 4], dtype=jnp.int32)

    loss, recon, mask = vcond_forward(params, cfg, img, input_ids, attention_mask, k_mask)
    jax.block_until_ready((loss, recon, mask))
    assert recon.shape == (B, 4, cfg["patch_size"] ** 2 * cfg["in_channels"])
    assert mask.shape == (B, 4)
    assert bool(jnp.isfinite(loss))
    print("KERNEL_OK")
</pallas_src>

<mosaic_0001>
module attributes {stable_mosaic.version = 11 : i64} {
  func.func @_linear_kernel(%arg0: i32, %arg1: i32, %arg2: i32, %arg3: memref<16x128xf32, #tpu.memory_space<vmem>>, %arg4: memref<128x128xf32, #tpu.memory_space<vmem>>, %arg5: memref<1x128xf32, #tpu.memory_space<vmem>>, %arg6: memref<16x128xf32, #tpu.memory_space<vmem>>, %arg7: memref<16x128xf32, #tpu.memory_space<vmem>>) attributes {dimension_semantics = [#tpu.dimension_semantics<parallel>, #tpu.dimension_semantics<parallel>, #tpu.dimension_semantics<arbitrary>], iteration_bounds = array<i64: 1, 1, 1>, scalar_prefetch = 0 : i64, scratch_operands = 1 : i64, tpu.core_type = #tpu.core_type<tc>, window_params = [{transform_indices = @transform_0, window_bounds = array<i64: 16, 128>}, {transform_indices = @transform_1, window_bounds = array<i64: 128, 128>}, {transform_indices = @transform_2, window_bounds = array<i64: 1, 128>}, {transform_indices = @transform_3, window_bounds = array<i64: 16, 128>}]} {
    %c0_i32 = arith.constant 0 : i32
    %0 = arith.cmpi eq, %arg2, %c0_i32 : i32
    %1 = arith.extui %0 : i1 to i32
    %c0_i32_0 = arith.constant 0 : i32
    %2 = arith.cmpi ne, %1, %c0_i32_0 : i32
    scf.if %2 {
      %cst_10 = arith.constant 0.000000e+00 : f32
      %14 = vector.broadcast %cst_10 : f32 to vector<16x128xf32>
      %c0_11 = arith.constant 0 : index
      %c0_12 = arith.constant 0 : index
      %15 = vector.load %arg7[%c0_11, %c0_12] : memref<16x128xf32, #tpu.memory_space<vmem>>, vector<16x128xf32>
      tpu.vector_store %arg7[%c0_11, %c0_12], %14 {strides = array<i32>} : memref<16x128xf32, #tpu.memory_space<vmem>>, vector<16x128xf32>,
    } else {
    }
    %c0 = arith.constant 0 : index
    %c0_1 = arith.constant 0 : index
    %3 = vector.load %arg7[%c0, %c0_1] : memref<16x128xf32, #tpu.memory_space<vmem>>, vector<16x128xf32>
    %c0_2 = arith.constant 0 : index
    %c0_3 = arith.constant 0 : index
    %4 = vector.load %arg3[%c0_2, %c0_3] : memref<16x128xf32, #tpu.memory_space<vmem>>, vector<16x128xf32>
    %5 = arith.truncf %4 : vector<16x128xf32> to vector<16x128xbf16>
    %c0_4 = arith.constant 0 : index
    %c0_5 = arith.constant 0 : index
    %6 = vector.load %arg4[%c0_4, %c0_5] : memref<128x128xf32, #tpu.memory_space<vmem>>, vector<128x128xf32>
    %7 = arith.truncf %6 : vector<128x128xf32> to vector<128x128xbf16>
    %cst = arith.constant dense<0.000000e+00> : vector<16x128xf32>
    %8 = tpu.matmul %5, %7, %cst {dimension_numbers = #tpu.dot_dimension_numbers<[1], [0], [0], [1], [0, 0, 1, 1], [], []>} : vector<16x128xbf16>, vector<128x128xbf16>, vector<16x128xf32> -> vector<16x128xf32>
    %9 = arith.addf %3, %8 : vector<16x128xf32>
    %c0_6 = arith.constant 0 : index
    %c0_7 = arith.constant 0 : index
    %10 = vector.load %arg7[%c0_6, %c0_7] : memref<16x128xf32, #tpu.memory_space<vmem>>, vector<16x128xf32>
    tpu.vector_store %arg7[%c0_6, %c0_7], %9 {strides = array<i32>} : memref<16x128xf32, #tpu.memory_space<vmem>>, vector<16x128xf32>,
    %c0_i32_8 = arith.constant 0 : i32
    %11 = arith.cmpi eq, %arg2, %c0_i32_8 : i32
    %12 = arith.extui %11 : i1 to i32
    %c0_i32_9 = arith.constant 0 : i32
    %13 = arith.cmpi ne, %12, %c0_i32_9 : i32
    scf.if %13 {
      %c0_10 = arith.constant 0 : index
      %c0_11 = arith.constant 0 : index
      %14 = vector.load %arg7[%c0_10, %c0_11] : memref<16x128xf32, #tpu.memory_space<vmem>>, vector<16x128xf32>
      %c0_12 = arith.constant 0 : index
      %c0_13 = arith.constant 0 : index
      %15 = vector.load %arg5[%c0_12, %c0_13] : memref<1x128xf32, #tpu.memory_space<vmem>>, vector<1x128xf32>
      %16 = vector.broadcast %15 : vector<1x128xf32> to vector<16x128xf32>
      %17 = arith.addf %14, %16 : vector<16x128xf32>
      %c0_14 = arith.constant 0 : index
      %c0_15 = arith.constant 0 : index
      %18 = vector.load %arg6[%c0_14, %c0_15] : memref<16x128xf32, #tpu.memory_space<vmem>>, vector<16x128xf32>
      tpu.vector_store %arg6[%c0_14, %c0_15], %17 {strides = array<i32>} : memref<16x128xf32, #tpu.memory_space<vmem>>, vector<16x128xf32>,
    } else {
    }
    return
  }
  func.func @transform_0(%arg0: i32, %arg1: i32, %arg2: i32) -> (i32, i32) {
    %c0_i32 = arith.constant 0 : i32
    return %arg0, %arg2 : i32, i32
  }
  func.func @transform_1(%arg0: i32, %arg1: i32, %arg2: i32) -> (i32, i32) {
    %c0_i32 = arith.constant 0 : i32
    return %arg2, %arg1 : i32, i32
  }
  func.func @transform_2(%arg0: i32, %arg1: i32, %arg2: i32) -> (i32, i32) {
    %c0_i32 = arith.constant 0 : i32
    %c0_i32_0 = arith.constant 0 : i32
    return %c0_i32, %arg1 : i32, i32
  }
  func.func @transform_3(%arg0: i32, %arg1: i32, %arg2: i32) -> (i32, i32) {
    %c0_i32 = arith.constant 0 : i32
    return %arg0, %arg1 : i32, i32
  }
}

</mosaic_0001>

<bundles_post_ra>
// kernel: tpu_custom_call.1
= control target key start
LH: loop header
LB: loop body
LE: loop exit
PB: predicated region body
PF: predicated region fallthrough
CT: control target
= control target key end

     0   :  { %8 = vsyncpa [#allocation4], 0  ;;  %s309_s0 = inlined_call_operand.hbm [shape: f32[16,128], index: 0, kind: input, shape index: {}]   ;;  %s310_s1 = inlined_call_operand.hbm [shape: f32[128,128], index: 1, kind: input, shape index: {}]   ;;  %s311_s2 = inlined_call_operand.vmem [shape: f32[1,128], index: 2, kind: input, shape index: {}]   ;;  %s312_s3 = inlined_call_operand.hbm [shape: f32[16,128], index: 3, kind: output, shape index: {}]  }
   0x1   :  { %9 = vsyncpa [#allocation7], 0 }
   0x2   :  { %10 = vsyncpa [#allocation5], 0  ;;  %s261_s12 = smov [#allocation3]  }
   0x3   :  { %s16_s13 = sshll.u32 %s261_s12, 4  ;;  %s17_s13 = int_to_ptr.vmem [resolvable:$true] %s16_s13 }
   0x4   :  { %s203_s14 = scalar_lea.vmem %s17_s13, 256  ;;  %p208_p1 = scmp.lt.s32.totalorder %s17_s13, %s17_s13 }
   0x5   :  { %p204_p0 = scmp.ne.s32.totalorder %s17_s13, %s203_s14  ;;  %p209_p2 = scmp.lt.s32.totalorder %s203_s14, %s203_s14 }
   0x7   :  { %p210_p3 = por %p209_p2, %p208_p1 }
   0x9   :  { %p211_p4 = pnand %p210_p3, %p204_p0 }
   0xb   :  { %214 = shalt.err (!%p211_p4)
}
   0xc   :  { %s262_s15 = smov 128   ;;  %s263_s16 = smov 8  }
   0xd   :  { %22 = dma.hbm_to_vmem [thread:$0]  %s309_s0, 256, %s17_s13, [#allocation4], %s262_s15, %s262_s15, %s263_s16  }
   0xe   :  { %s264_s19 = smov [#allocation6]  }
   0xf   :  { %s28_s20 = sshll.u32 %s264_s19, 4  ;;  %s29_s20 = int_to_ptr.vmem [resolvable:$true] %s28_s20 }
  0x10   :  { %s223_s21 = scalar_lea.vmem %s29_s20, 2048  ;;  %p228_p6 = scmp.lt.s32.totalorder %s29_s20, %s29_s20 }
  0x11   :  { %p224_p5 = scmp.ne.s32.totalorder %s29_s20, %s223_s21  ;;  %p229_p7 = scmp.lt.s32.totalorder %s223_s21, %s223_s21 }
  0x13   :  { %p230_p8 = por %p229_p7, %p228_p6 }
  0x15   :  { %p231_p9 = pnand %p230_p8, %p224_p5 }
  0x17   :  { %234 = shalt.err (!%p231_p9)
}
  0x18   :  { %34 = dma.hbm_to_vmem [thread:$0]  %s310_s1, 2048, %s29_s20, [#allocation7], %s262_s15, %s262_s15, %s263_s16  }
  0x19   :  { %255 = dma.done.wait [#allocation4], 256  }
  0x1a   :  { %256 = vsyncadd [#allocation4], 4294967040 }
  0x1b   :  { %257 = dma.done.wait [#allocation7], 2048  }
  0x1c   :  { %258 = vsyncadd [#allocation7], 4294965248  ;;  %v265_v0 = vmov 0.0   ;;  %vm266_vm0 = vmmov 0   ;;  %v69_v1 = vld [vmem:[#allocation6 + $0x70] sm:$0xff]  ;;  %v70_v2 = vld [vmem:[#allocation6 + $0x78] sm:$0xff] }
  0x1d   :  { %168 = vmatprep.subr.bf16.mxu0 %v265_v0  ;;  %184 = vmatprep.mubr.msk.bf16.mxu0 %vm266_vm0, %v265_v0  ;;  %v67_v3 = vld [vmem:[#allocation6 + $0x60] sm:$0xff]  ;;  %v78_v4 = vpack.c.bf16 %v70_v2, %v69_v1  ;;  %v68_v5 = vld [vmem:[#allocation6 + $0x68] sm:$0xff]  ;;  %v65_v7 = vld [vmem:[#allocation6 + $0x50] sm:$0xff]  ;;  %s267_s24 = smov [#allocation8]  }
  0x1e   :  { %v77_v6 = vpack.c.bf16 %v68_v5, %v67_v3  ;;  %v66_v8 = vld [vmem:[#allocation6 + $0x58] sm:$0xff]  ;;  %v63_v10 = vld [vmem:[#allocation6 + $0x40] sm:$0xff]  ;;  %v64_v11 = vld [vmem:[#allocation6 + $0x48] sm:$0xff]  ;;  %s145_s25 = sshll.u32 %s267_s24, 4  ;;  %s146_s25 = int_to_ptr.vmem [resolvable:$true] %s145_s25 }
  0x1f   :  { %169 = vmatpush3.bf16.msra.mxu0 %v78_v4  ;;  %v76_v9 = vpack.c.bf16 %v66_v8, %v65_v7  ;;  %v75_v12 = vpack.c.bf16 %v64_v11, %v63_v10  ;;  %v61_v13 = vld [vmem:[#allocation6 + $0x30] sm:$0xff]  ;;  %v62_v14 = vld [vmem:[#allocation6 + $0x38] sm:$0xff]  ;;  %v59_v16 = vld [vmem:[#allocation6 + $0x20] sm:$0xff]  ;;  %s235_s26 = scalar_lea.vmem %s146_s25, 256  ;;  %p240_p11 = scmp.lt.s32.totalorder %s146_s25, %s146_s25 }
  0x20   :  { %170 = vmatprep.subr.bf16.mxu0 %v265_v0  ;;  %v74_v15 = vpack.c.bf16 %v62_v14, %v61_v13  ;;  %v60_v17 = vld [vmem:[#allocation6 + $0x28] sm:$0xff]  ;;  %v57_v19 = vld [vmem:[#allocation6 + $0x10] sm:$0xff]  ;;  %v58_v20 = vld [vmem:[#allocation6 + $0x18] sm:$0xff]  ;;  %p236_p10 = scmp.ne.s32.totalorder %s146_s25, %s235_s26  ;;  %p241_p12 = scmp.lt.s32.totalorder %s235_s26, %s235_s26 }
  0x21   :  { %v73_v18 = vpack.c.bf16 %v60_v17, %v59_v16  ;;  %v72_v21 = vpack.c.bf16 %v58_v20, %v57_v19  ;;  %v55_v22 = vld [vmem:[#allocation6] sm:$0xff]  ;;  %v56_v23 = vld [vmem:[#allocation6 + $0x8] sm:$0xff]  ;;  %v52_v25 = vld [vmem:[#allocation3] sm:$0xff] }
  0x22   :  { %v71_v24 = vpack.c.bf16 %v56_v23, %v55_v22  ;;  %v53_v26 = vld [vmem:[#allocation3 + $0x8] sm:$0xff]  ;;  %v158_v28 = vld [vmem:[%s311_s2] ss:$0 sm:$0xff]  ;;  %p242_p13 = por %p241_p12, %p240_p11 }
  0x23   :  { %171 = vmatpush3.bf16.msra.mxu0 %v77_v6  ;;  %v54_v27 = vpack.c.bf16 %v53_v26, %v52_v25 }
  0x24   :  { %172 = vmatprep.subr.bf16.mxu0 %v265_v0  ;;  %p243_p0 = pnand %p242_p13, %p236_p10 }
  0x27   :  { %173 = vmatpush3.bf16.msra.mxu0 %v76_v9 }
  0x28   :  { %174 = vmatprep.subr.bf16.mxu0 %v265_v0 }
  0x2b   :  { %175 = vmatpush3.bf16.msra.mxu0 %v75_v12 }
  0x2c   :  { %176 = vmatprep.subr.bf16.mxu0 %v265_v0 }
  0x2f   :  { %177 = vmatpush3.bf16.msra.mxu0 %v74_v15 }
  0x30   :  { %178 = vmatprep.subr.bf16.mxu0 %v265_v0 }
  0x33   :  { %179 = vmatpush3.bf16.msra.mxu0 %v73_v18 }
  0x34   :  { %180 = vmatprep.subr.bf16.mxu0 %v265_v0 }
  0x37   :  { %181 = vmatpush3.bf16.msra.mxu0 %v72_v21 }
  0x38   :  { %182 = vmatprep.subr.bf16.mxu0 %v265_v0 }
  0x3b   :  { %183 = vmatpush3.bf16.msra.mxu0 %v71_v24 }
  0x3e   :  { %185 = vmatmul.mubr.bf16.vlgmr.msra.gmra.mxu0 %v54_v27 }
  0xfe   :  { %v113_v29 = vpop.f32.mrf.mxu0 }
  0xff   :  { %v136_v30 = vadd.f32 %v158_v28, %v113_v29 }
 0x100   :  { %v186_v31 = vpop.f32.mrf.mxu0 }
 0x101   :  { %138 = vst [vmem:[#allocation8] sm:$0xff] %v136_v30 }
 0x102   :  { %v116_v32 = vpop.f32.mrf.mxu0 }
 0x103   :  { %v137_v33 = vadd.f32 %v158_v28, %v116_v32 }
 0x104   :  { %v187_v34 = vpop.f32.mrf.mxu0 }
 0x105   :  { %139 = vst [vmem:[#allocation8 + $0x8] sm:$0xff] %v137_v33 }
 0x106   :  { %246 = shalt.err (!%p243_p0)
}
 0x107   :  { %151 = dma.vmem_to_hbm [thread:$0]  %s146_s25, 256, %s312_s3, [#allocation5], %s262_s15, %s262_s15, %s263_s16  }
 0x108   :  { %259 = dma.done.wait [#allocation5], 256  }
 0x109   :  { %260 = vsyncadd [#allocation5], 4294967040 }
 0x10a   :  { %155 = vsyncpa [#allocation4], 1 }
 0x10b   :  { %156 = vsyncpa [#allocation7], 1 }
 0x10c   :  { %157 = vsyncpa [#allocation5], 1 }

</bundles_post_ra>
